<compile_context>
chip_gen: v5e
topology: v5e:2x2
jax: 0.10.0
libtpu: 0.0.40
codegen_flags: <defaults>
</compile_context>

<pallas_src>
import jax
import jax.numpy as jnp
import numpy as np
from jax import lax
from jax.experimental import pallas as pl
from jax.experimental.pallas import tpu as pltpu

EPS = 1e-3


def _cdiv(a, b):
    return -(-a // b)


def _round_up(v, m):
    return ((v + m - 1) // m) * m


def _stats_kernel(x_ref, seg_ref, stats_ref):
    """Pass 1: accumulate per-group [sum, sum_sq, count] for this row block."""
    t = pl.program_id(1)

    @pl.when(t == 0)
    def _():
        stats_ref[...] = jnp.zeros_like(stats_ref)

    x = x_ref[...]                                   # (BR, L) f32
    seg = seg_ref[...]                               # (BR, L) i32 (-1 = padding)
    gp = stats_ref.shape[1]

    # (gp, 1) group-index column; tiny, so rebuilding it per step is free
    # (the old full (G, T) iota is gone -- comparisons broadcast instead).
    gidx = lax.broadcasted_iota(jnp.int32, (gp, 1), 0)
    mask = seg[:, None, :] == gidx[None, :, :]       # (BR, gp, L) bool

    xm = jnp.where(mask, x[:, None, :], 0.0)         # (BR, gp, L) f32
    cm = jnp.where(mask, 1.0, 0.0)                   # (BR, gp, L) f32

    # reduce leading (row) axis first: pure vreg adds, no relayout
    s_gl = jnp.sum(xm, axis=0)                       # (gp, L)
    ss_gl = jnp.sum(xm * xm, axis=0)                 # (gp, L)  (select^2 == select of x^2)
    c_gl = jnp.sum(cm, axis=0)                       # (gp, L)

    # then a single lane reduction per group
    s = jnp.sum(s_gl, axis=1, keepdims=True)         # (gp, 1)
    ss = jnp.sum(ss_gl, axis=1, keepdims=True)       # (gp, 1)
    cnt = jnp.sum(c_gl, axis=1, keepdims=True)       # (gp, 1)

    stats_ref[0, :, 0:1] += s
    stats_ref[0, :, 1:2] += ss
    stats_ref[0, :, 2:3] += cnt


def _apply_kernel(params_ref, x_ref, seg_ref, o_ref):
    """Pass 2: out = x * scale[seg] + shift[seg] via a mask-select gather."""
    x = x_ref[...]                                   # (BR, L) f32
    seg = seg_ref[...]                               # (BR, L) i32
    gp = params_ref.shape[0]

    gidx = lax.broadcasted_iota(jnp.int32, (gp, 1), 0)   # (gp, 1)
    # group axis leading -> final reduction over axis 0 is plain vreg adds
    mask = seg[None, :, :] == gidx[:, :, None]       # (gp, BR, L) bool

    scale_b = params_ref[:, 0:1][:, :, None]         # (gp, 1, 1)
    shift_b = params_ref[:, 1:2][:, :, None]         # (gp, 1, 1)

    scale_e = jnp.sum(jnp.where(mask, scale_b, 0.0), axis=0)   # (BR, L)
    shift_e = jnp.sum(jnp.where(mask, shift_b, 0.0), axis=0)   # (BR, L)

    # padded elements (seg == -1) gather (0, 0) -> 0; sliced off in the wrapper
    o_ref[...] = x * scale_e + shift_e


def _plan(n, gp):
    """Pick lane width, rows-per-block and a VMEM limit for this generation."""
    try:
        phys_vmem = int(pltpu.get_tpu_info().vmem_capacity_bytes)
    except Exception:
        phys_vmem = 64 * 1024 * 1024                 # v7x-safe fallback
    vmem_limit = min(int(phys_vmem * 3 // 4), 100 * 1024 * 1024)

    # bytes of VMEM per block element: double-buffered x/seg/out blocks plus
    # ~6 (BR, gp, L)-sized f32/bool temporaries for the masked reductions.
    per_elem = 24 + 24 * gp
    blk_elems = (vmem_limit // 2) // per_elem
    blk_elems = max(8 * 128, min(blk_elems, 256 * 1024))   # cap ~1 MiB of f32

    lanes = min(2048, _round_up(max(n, 1), 128))
    lanes = min(lanes, max(128, (blk_elems // 8) // 128 * 128))
    rows_needed = _cdiv(max(n, 1), lanes)
    br = min(blk_elems // lanes, _round_up(rows_needed, 8))
    br = max(8, (br // 8) * 8)
    return vmem_limit, lanes, br, rows_needed


def normalize_attention(inputs, batch, gain, bias, *, num_groups):
    """JAX wrapper. inputs: any shape (flattened); batch: (N,) int segment ids."""
    x = inputs.reshape(-1).astype(jnp.float32)
    seg = batch.reshape(-1).astype(jnp.int32)
    n = x.shape[0]

    gp = max(8, _round_up(int(num_groups), 8))
    vmem_limit, lanes, br, rows_needed = _plan(n, gp)

    num_blocks = _cdiv(rows_needed, br)
    p_chunks = 2 if num_blocks >= 2 else 1           # v7x: one chunk per TensorCore
    t_inner = _cdiv(num_blocks, p_chunks)
    rows_total = p_chunks * t_inner * br
    n_pad = rows_total * lanes

    x_p = jnp.pad(x, (0, n_pad - n)).reshape(rows_total, lanes)
    seg_p = jnp.pad(seg, (0, n_pad - n),
                    constant_values=-1).reshape(rows_total, lanes)

    # ---- Pass 1: per-chunk partial [sum, sum_sq, count] per group.
    stats = pl.pallas_call(
        _stats_kernel,
        out_shape=jax.ShapeDtypeStruct((p_chunks, gp, 3), jnp.float32),
        grid=(p_chunks, t_inner),
        in_specs=[
            pl.BlockSpec((br, lanes), lambda p, t: (p * t_inner + t, 0)),
            pl.BlockSpec((br, lanes), lambda p, t: (p * t_inner + t, 0)),
        ],
        out_specs=pl.BlockSpec((1, gp, 3), lambda p, t: (p, 0, 0)),
        compiler_params=pltpu.CompilerParams(
            dimension_semantics=("parallel", "arbitrary"),
            vmem_limit_bytes=vmem_limit),
    )(x_p, seg_p)

    # ---- Tiny O(G) finalize in plain JAX: fold stats into (scale, shift).
    tot = jnp.sum(stats, axis=0)                     # (gp, 3)
    seg_sum, seg_sumsq, cnt = tot[:, 0], tot[:, 1], tot[:, 2]
    cnt_safe = jnp.maximum(cnt, 1.0)                 # scatter_mean clamp
    mean = seg_sum / cnt_safe
    var = jnp.maximum(seg_sumsq / cnt_safe - mean * mean, 0.0)
    gain_v = jnp.asarray(gain, jnp.float32).reshape(-1)
    bias_v = jnp.asarray(bias, jnp.float32).reshape(-1)
    scale = gain_v * (1.0 / (jnp.sqrt(var) + EPS))
    shift = bias_v - scale * mean
    params = jnp.stack([scale, shift], axis=1).astype(jnp.float32)   # (gp, 2)

    # ---- Pass 2: out = x * scale[seg] + shift[seg] (fully parallel).
    out2d = pl.pallas_call(
        _apply_kernel,
        out_shape=jax.ShapeDtypeStruct((rows_total, lanes), jnp.float32),
        grid=(p_chunks * t_inner,),
        in_specs=[
            pl.BlockSpec((gp, 2), lambda t: (0, 0)),                 # params
            pl.BlockSpec((br, lanes), lambda t: (t, 0)),             # x block
            pl.BlockSpec((br, lanes), lambda t: (t, 0)),             # seg block
        ],
        out_specs=pl.BlockSpec((br, lanes), lambda t: (t, 0)),
        compiler_params=pltpu.CompilerParams(
            dimension_semantics=("parallel",),
            vmem_limit_bytes=vmem_limit),
    )(params, x_p, seg_p)

    return out2d.reshape(-1)[:n].reshape(n, 1)


def _reference(inputs, batch, gain, bias, num_groups):
    """Pure-JAX reference mirroring the PyTorch scatter ops."""
    x = inputs.reshape(-1, 1).astype(jnp.float32)
    batch = batch.astype(jnp.int32)
    ones = jnp.ones((x.shape[0], 1), jnp.float32)
    seg_sum = jax.ops.segment_sum(x, batch, num_segments=num_groups)
    counts = jax.ops.segment_sum(ones, batch, num_segments=num_groups)
    mean = seg_sum / jnp.maximum(counts, 1.0)
    centered = x - mean[batch]
    sumsq = jax.ops.segment_sum(centered ** 2, batch, num_segments=num_groups)
    std = jnp.sqrt(sumsq[batch] / counts[batch]) + EPS
    return gain.reshape(1, 1) * (centered / std) + bias.reshape(1, 1)


if __name__ == "__main__":
    key = jax.random.PRNGKey(0)
    k_inp, k_batch = jax.random.split(key)

    # small synthetic shapes: N = 8 * 32 = 256 elements, 4 segments
    inputs = jax.random.normal(k_inp, (8, 32), dtype=jnp.float32)
    num_groups = 4
    batch = jax.random.randint(k_batch, (inputs.size,), 0, num_groups,
                               dtype=jnp.int32)

    # deterministic parameter init, as in the module's __init__
    gain = jnp.ones((1,), jnp.float32)
    bias = jnp.zeros((1,), jnp.float32)

    out = normalize_attention(inputs, batch, gain, bias, num_groups=num_groups)
    out = jax.block_until_ready(out)

    ref = _reference(inputs, batch, gain, bias, num_groups)
    np.testing.assert_allclose(np.asarray(out), np.asarray(ref),
                               rtol=1e-5, atol=1e-5)

    print("KERNEL_OK")
</pallas_src>

<mosaic_0001>
module attributes {stable_mosaic.version = 11 : i64} {
  func.func @_stats_kernel(%arg0: i32, %arg1: i32, %arg2: memref<8x256xf32, #tpu.memory_space<vmem>>, %arg3: memref<8x256xi32, #tpu.memory_space<vmem>>, %arg4: memref<1x8x3xf32, #tpu.memory_space<vmem>>) attributes {dimension_semantics = [#tpu.dimension_semantics<parallel>, #tpu.dimension_semantics<arbitrary>], iteration_bounds = array<i64: 1, 1>, scalar_prefetch = 0 : i64, scratch_operands = 0 : i64, tpu.core_type = #tpu.core_type<tc>, window_params = [{transform_indices = @transform_0, window_bounds = array<i64: 8, 256>}, {transform_indices = @transform_1, window_bounds = array<i64: 8, 256>}, {transform_indices = @transform_2, window_bounds = array<i64: 1, 8, 3>}]} {
    %c0_i32 = arith.constant 0 : i32
    %0 = arith.cmpi eq, %arg1, %c0_i32 : i32
    %1 = arith.extui %0 : i1 to i32
    %c0_i32_0 = arith.constant 0 : i32
    %2 = arith.cmpi ne, %1, %c0_i32_0 : i32
    scf.if %2 {
      %cst_28 = arith.constant 0.000000e+00 : f32
      %47 = vector.broadcast %cst_28 : f32 to vector<1x8x3xf32>
      %c0_29 = arith.constant 0 : index
      %c0_30 = arith.constant 0 : index
      %c0_31 = arith.constant 0 : index
      %48 = vector.load %arg4[%c0_29, %c0_30, %c0_31] : memref<1x8x3xf32, #tpu.memory_space<vmem>>, vector<1x8x3xf32>
      tpu.vector_store %arg4[%c0_29, %c0_30, %c0_31], %47 {strides = array<i32>} : memref<1x8x3xf32, #tpu.memory_space<vmem>>, vector<1x8x3xf32>,
    } else {
    }
    %c0 = arith.constant 0 : index
    %c0_1 = arith.constant 0 : index
    %3 = vector.load %arg2[%c0, %c0_1] : memref<8x256xf32, #tpu.memory_space<vmem>>, vector<8x256xf32>
    %c0_2 = arith.constant 0 : index
    %c0_3 = arith.constant 0 : index
    %4 = vector.load %arg3[%c0_2, %c0_3] : memref<8x256xi32, #tpu.memory_space<vmem>>, vector<8x256xi32>
    %5 = tpu.iota {dimensions = array<i32: 0>} : vector<8x1xi32>
    %6 = vector.shape_cast %4 : vector<8x256xi32> to vector<8x1x256xi32>
    %7 = vector.shape_cast %5 : vector<8x1xi32> to vector<1x8x1xi32>
    %8 = vector.broadcast %6 : vector<8x1x256xi32> to vector<8x8x256xi32>
    %9 = vector.broadcast %7 : vector<1x8x1xi32> to vector<8x8x256xi32>
    %10 = arith.cmpi eq, %8, %9 : vector<8x8x256xi32>
    %11 = vector.shape_cast %3 : vector<8x256xf32> to vector<8x1x256xf32>
    %cst = arith.constant 0.000000e+00 : f32
    %12 = vector.shape_cast %11 : vector<8x1x256xf32> to vector<8x1x256xf32>
    %13 = vector.broadcast %12 : vector<8x1x256xf32> to vector<8x8x256xf32>
    %14 = vector.broadcast %cst : f32 to vector<8x8x256xf32>
    %15 = arith.select %10, %13, %14 : vector<8x8x256xi1>, vector<8x8x256xf32>
    %cst_4 = arith.constant 1.000000e+00 : f32
    %cst_5 = arith.constant 0.000000e+00 : f32
    %16 = vector.broadcast %cst_4 : f32 to vector<8x8x256xf32>
    %17 = vector.broadcast %cst_5 : f32 to vector<8x8x256xf32>
    %18 = arith.select %10, %16, %17 : vector<8x8x256xi1>, vector<8x8x256xf32>
    %cst_6 = arith.constant dense<0.000000e+00> : vector<8x256xf32>
    %19 = vector.multi_reduction <add>, %15, %cst_6 [0] : vector<8x8x256xf32> to vector<8x256xf32>
    %20 = arith.mulf %15, %15 : vector<8x8x256xf32>
    %cst_7 = arith.constant dense<0.000000e+00> : vector<8x256xf32>
    %21 = vector.multi_reduction <add>, %20, %cst_7 [0] : vector<8x8x256xf32> to vector<8x256xf32>
    %cst_8 = arith.constant dense<0.000000e+00> : vector<8x256xf32>
    %22 = vector.multi_reduction <add>, %18, %cst_8 [0] : vector<8x8x256xf32> to vector<8x256xf32>
    %cst_9 = arith.constant dense<0.000000e+00> : vector<8xf32>
    %23 = vector.multi_reduction <add>, %19, %cst_9 [1] : vector<8x256xf32> to vector<8xf32>
    %24 = vector.shape_cast %23 : vector<8xf32> to vector<8x1xf32>
    %cst_10 = arith.constant dense<0.000000e+00> : vector<8xf32>
    %25 = vector.multi_reduction <add>, %21, %cst_10 [1] : vector<8x256xf32> to vector<8xf32>
    %26 = vector.shape_cast %25 : vector<8xf32> to vector<8x1xf32>
    %cst_11 = arith.constant dense<0.000000e+00> : vector<8xf32>
    %27 = vector.multi_reduction <add>, %22, %cst_11 [1] : vector<8x256xf32> to vector<8xf32>
    %28 = vector.shape_cast %27 : vector<8xf32> to vector<8x1xf32>
    %c0_12 = arith.constant 0 : index
    %c0_13 = arith.constant 0 : index
    %c0_14 = arith.constant 0 : index
    %29 = vector.load %arg4[%c0_12, %c0_13, %c0_14] : memref<1x8x3xf32, #tpu.memory_space<vmem>>, vector<1x8x1xf32>
    %30 = vector.shape_cast %29 : vector<1x8x1xf32> to vector<8x1xf32>
    %31 = arith.addf %30, %24 : vector<8x1xf32>
    %c0_15 = arith.constant 0 : index
    %c0_16 = arith.constant 0 : index
    %c0_17 = arith.constant 0 : index
    %32 = vector.load %arg4[%c0_15, %c0_16, %c0_17] : memref<1x8x3xf32, #tpu.memory_space<vmem>>, vector<1x8x1xf32>
    %33 = vector.shape_cast %32 : vector<1x8x1xf32> to vector<8x1xf32>
    %34 = vector.shape_cast %31 : vector<8x1xf32> to vector<1x8x1xf32>
    tpu.vector_store %arg4[%c0_15, %c0_16, %c0_17], %34 {strides = array<i32>} : memref<1x8x3xf32, #tpu.memory_space<vmem>>, vector<1x8x1xf32>,
    %c0_18 = arith.constant 0 : index
    %c0_19 = arith.constant 0 : index
    %c1 = arith.constant 1 : index
    %35 = vector.load %arg4[%c0_18, %c0_19, %c1] : memref<1x8x3xf32, #tpu.memory_space<vmem>>, vector<1x8x1xf32>
    %36 = vector.shape_cast %35 : vector<1x8x1xf32> to vector<8x1xf32>
    %37 = arith.addf %36, %26 : vector<8x1xf32>
    %c0_20 = arith.constant 0 : index
    %c0_21 = arith.constant 0 : index
    %c1_22 = arith.constant 1 : index
    %38 = vector.load %arg4[%c0_20, %c0_21, %c1_22] : memref<1x8x3xf32, #tpu.memory_space<vmem>>, vector<1x8x1xf32>
    %39 = vector.shape_cast %38 : vector<1x8x1xf32> to vector<8x1xf32>
    %40 = vector.shape_cast %37 : vector<8x1xf32> to vector<1x8x1xf32>
    tpu.vector_store %arg4[%c0_20, %c0_21, %c1_22], %40 {strides = array<i32>} : memref<1x8x3xf32, #tpu.memory_space<vmem>>, vector<1x8x1xf32>,
    %c0_23 = arith.constant 0 : index
    %c0_24 = arith.constant 0 : index
    %c2 = arith.constant 2 : index
    %41 = vector.load %arg4[%c0_23, %c0_24, %c2] : memref<1x8x3xf32, #tpu.memory_space<vmem>>, vector<1x8x1xf32>
    %42 = vector.shape_cast %41 : vector<1x8x1xf32> to vector<8x1xf32>
    %43 = arith.addf %42, %28 : vector<8x1xf32>
    %c0_25 = arith.constant 0 : index
    %c0_26 = arith.constant 0 : index
    %c2_27 = arith.constant 2 : index
    %44 = vector.load %arg4[%c0_25, %c0_26, %c2_27] : memref<1x8x3xf32, #tpu.memory_space<vmem>>, vector<1x8x1xf32>
    %45 = vector.shape_cast %44 : vector<1x8x1xf32> to vector<8x1xf32>
    %46 = vector.shape_cast %43 : vector<8x1xf32> to vector<1x8x1xf32>
    tpu.vector_store %arg4[%c0_25, %c0_26, %c2_27], %46 {strides = array<i32>} : memref<1x8x3xf32, #tpu.memory_space<vmem>>, vector<1x8x1xf32>,
    return
  }
  func.func @transform_0(%arg0: i32, %arg1: i32) -> (i32, i32) {
    %c1_i32 = arith.constant 1 : i32
    %0 = arith.muli %arg0, %c1_i32 : i32
    %1 = arith.addi %0, %arg1 : i32
    %c0_i32 = arith.constant 0 : i32
    %c0_i32_0 = arith.constant 0 : i32
    return %1, %c0_i32 : i32, i32
  }
  func.func @transform_1(%arg0: i32, %arg1: i32) -> (i32, i32) {
    %c1_i32 = arith.constant 1 : i32
    %0 = arith.muli %arg0, %c1_i32 : i32
    %1 = arith.addi %0, %arg1 : i32
    %c0_i32 = arith.constant 0 : i32
    %c0_i32_0 = arith.constant 0 : i32
    return %1, %c0_i32 : i32, i32
  }
  func.func @transform_2(%arg0: i32, %arg1: i32) -> (i32, i32, i32) {
    %c0_i32 = arith.constant 0 : i32
    %c0_i32_0 = arith.constant 0 : i32
    %c0_i32_1 = arith.constant 0 : i32
    return %arg0, %c0_i32, %c0_i32_0 : i32, i32, i32
  }
}

</mosaic_0001>

<bundles_post_ra>
// kernel: tpu_custom_call.1
= control target key start
LH: loop header
LB: loop body
LE: loop exit
PB: predicated region body
PF: predicated region fallthrough
CT: control target
= control target key end

     0   :  { %7 = vsyncpa [#allocation3], 0  ;;  %s560_s0 = inlined_call_operand.hbm [shape: f32[8,256], index: 0, kind: input, shape index: {}]   ;;  %s561_s1 = inlined_call_operand.hbm [shape: s32[8,256], index: 1, kind: input, shape index: {}]   ;;  %s562_s2 = inlined_call_operand.vmem [shape: f32[1,8,3], index: 2, kind: output, shape index: {}]  }
   0x1   :  { %s18_s11 = sshll.u32 %s560_s0, 4  ;;  %s19_s11 = int_to_ptr.hbm [resolvable:$true] %s18_s11 }
   0x2   :  { %8 = vsyncpa [#allocation5], 0  ;;  %s339_s12 = smov [#allocation2]   ;;  %s33_s16 = sshll.u32 %s561_s1, 4  ;;  %s34_s16 = int_to_ptr.hbm [resolvable:$true] %s33_s16 }
   0x3   :  { %s20_s13 = sshll.u32 %s339_s12, 4  ;;  %s340_s17 = smov [#allocation4]   ;;  %s21_s13 = int_to_ptr.vmem [resolvable:$true] %s20_s13 }
   0x4   :  { %23 = dma.hbm_to_vmem [thread:$0]  %s19_s11, 256, %s21_s13, [#allocation3]  }
   0x5   :  { %s35_s18 = sshll.u32 %s340_s17, 4  ;;  %s36_s18 = int_to_ptr.vmem [resolvable:$true] %s35_s18 }
   0x6   :  { %38 = dma.hbm_to_vmem [thread:$0]  %s34_s16, 256, %s36_s18, [#allocation5]  }
   0x7   :  { %335 = dma.done.wait [#allocation3], 256  }
   0x8   :  { %336 = vsyncadd [#allocation3], 4294967040 }
   0x9   :  { %337 = dma.done.wait [#allocation5], 256  }
   0xa   :  { %338 = vsyncadd [#allocation5], 4294967040  ;;  %v57_v0 = vld [vmem:[#allocation4] sm:$0xff]  ;;  %v58_v1 = vld [vmem:[#allocation4 + $0x8] sm:$0xff]  ;;  %vm64_vm0 = vcmask 1041409   ;;  %vm67_vm1 = vcmask 1042434   ;;  %v59_v4 = vlaneseq }
   0xb   :  { %v56_v2 = vld [vmem:[#allocation2 + $0x8] sm:$0xff]  ;;  %v61_v3 = vrot.slane %v58_v1, 7  ;;  %vm70_vm2 = vcmask 1043459   ;;  %vm73_vm3 = vcmask 1044484   ;;  %vm76_vm4 = vcmask 1045509   ;;  %v55_v9 = vld [vmem:[#allocation2] sm:$0xff] }
   0xc   :  { %vm79_vm5 = vcmask 1046534   ;;  %vm82_vm6 = vcmask 1046528   ;;  %vm62_vm7 = vcmask 1040384   ;;  %v119_v8 = vrot.slane %v56_v2, 7 }
   0xd   :  { %v65_v5 = vsel %vm64_vm0, %v57_v0, %v61_v3  ;;  %v68_v6 = vsel %vm67_vm1, %v57_v0, %v61_v3  ;;  %v71_v7 = vsel %vm70_vm2, %v57_v0, %v61_v3  ;;  %v74_v10 = vsel %vm73_vm3, %v57_v0, %v61_v3 }
   0xe   :  { %v77_v11 = vsel %vm76_vm4, %v57_v0, %v61_v3  ;;  %v66_v12 = vrot.slane %v65_v5, 1  ;;  %v80_v13 = vsel %vm79_vm5, %v57_v0, %v61_v3  ;;  %v83_v14 = vsel %vm82_vm6, %v61_v3, %v57_v0 }
   0xf   :  { %v370_v15 = vshrl.u32 %v59_v4, 7  ;;  %v63_v16 = vsel %vm62_vm7, %v57_v0, %v61_v3  ;;  %v69_v17 = vrot.slane %v68_v6, 2  ;;  %v72_v18 = vrot.slane %v71_v7, 3 }
  0x10   :  { %v75_v19 = vrot.slane %v74_v10, 4  ;;  %v78_v20 = vrot.slane %v77_v11, 5  ;;  %v120_v21 = vsel %vm62_vm7, %v55_v9, %v119_v8  ;;  %v121_v22 = vsel %vm64_vm0, %v55_v9, %v119_v8 }
  0x11   :  { %v81_v23 = vrot.slane %v80_v13, 6  ;;  %v84_v24 = vrot.slane %v83_v14, 7  ;;  %v123_v25 = vsel %vm67_vm1, %v55_v9, %v119_v8  ;;  %v125_v26 = vsel %vm70_vm2, %v55_v9, %v119_v8 }
  0x12   :  { %v85_v27 = vperm.slane %v63_v16, 0  ;;  %v86_v28 = vperm.slane %v63_v16, 1  ;;  %v377_v29 = vperm.slane %v66_v12, 0  ;;  %v379_v30 = vperm.slane %v66_v12, 1 }
  0x13   :  { %v381_v31 = vperm.slane %v69_v17, 0  ;;  %v383_v32 = vperm.slane %v69_v17, 1  ;;  %v385_v33 = vperm.slane %v72_v18, 0  ;;  %v387_v34 = vperm.slane %v72_v18, 1 }
  0x14   :  { %v389_v35 = vperm.slane %v75_v19, 0  ;;  %v391_v36 = vperm.slane %v75_v19, 1  ;;  %v393_v37 = vperm.slane %v78_v20, 0  ;;  %v395_v38 = vperm.slane %v78_v20, 1 }
  0x15   :  { %v397_v39 = vperm.slane %v81_v23, 0  ;;  %v399_v40 = vperm.slane %v81_v23, 1  ;;  %v401_v41 = vperm.slane %v84_v24, 0  ;;  %v403_v42 = vperm.slane %v84_v24, 1 }
  0x16   :  { %vm406_vm8 = vcmp.eq.s32.totalorder %v85_v27, %v370_v15  ;;  %vm411_vm9 = vcmp.eq.s32.totalorder %v86_v28, %v370_v15  ;;  %vm103_vm10 = vcmp.eq.s32.totalorder %v377_v29, %v370_v15  ;;  %v122_v45 = vrot.slane %v121_v22, 1 }
  0x17   :  { %vm104_vm11 = vcmp.eq.s32.totalorder %v379_v30, %v370_v15  ;;  %vm105_vm12 = vcmp.eq.s32.totalorder %v381_v31, %v370_v15  ;;  %vm106_vm13 = vcmp.eq.s32.totalorder %v383_v32, %v370_v15  ;;  %vm107_vm14 = vcmp.eq.s32.totalorder %v385_v33, %v370_v15 }
  0x18   :  { %vm108_vm15 = vcmp.eq.s32.totalorder %v387_v34, %v370_v15  ;;  %v124_v46 = vrot.slane %v123_v25, 2  ;;  %v127_v47 = vsel %vm73_vm3, %v55_v9, %v119_v8  ;;  %v129_v48 = vsel %vm76_vm4, %v55_v9, %v119_v8 }
  0x19   :  { %vm109_vm0 = vcmp.eq.s32.totalorder %v389_v35, %v370_v15  ;;  %vm110_vm1 = vcmp.eq.s32.totalorder %v391_v36, %v370_v15  ;;  %v126_v49 = vrot.slane %v125_v26, 3  ;;  %v131_v50 = vsel %vm79_vm5, %v55_v9, %v119_v8 }
  0x1a   :  { %v133_v51 = vsel %vm82_vm6, %v119_v8, %v55_v9  ;;  %v135_v52 = vperm.slane %v120_v21, 0  ;;  %v136_v53 = vperm.slane %v120_v21, 1  ;;  %v137_v54 = vperm.slane %v122_v45, 0 }
  0x1b   :  { %v138_v55 = vperm.slane %v122_v45, 1  ;;  %vm111_vm2 = vcmp.eq.s32.totalorder %v393_v37, %v370_v15  ;;  %vm563_vm3 = vcmp.eq.s32.totalorder %v395_v38, %v370_v15  ;;  %v128_v56 = vrot.slane %v127_v47, 4 }
  0x1c   :  { %v130_v57 = vrot.slane %v129_v48, 5  ;;  %vm113_vm4 = vcmp.eq.s32.totalorder %v397_v39, %v370_v15  ;;  %v132_v58 = vrot.slane %v131_v50, 6  ;;  %v139_v59 = vperm.slane %v124_v46, 0 }
  0x1d   :  { %v140_v60 = vperm.slane %v124_v46, 1  ;;  %vm114_vm5 = vcmp.eq.s32.totalorder %v399_v40, %v370_v15  ;;  %v134_v61 = vrot.slane %v133_v51, 7  ;;  %v141_v62 = vperm.slane %v126_v49, 0 }
  0x1e   :  { %v142_v63 = vperm.slane %v126_v49, 1  ;;  %v167_v0 = vsel %vm406_vm8, %v135_v52, 0.0  ;;  %v168_v1 = vsel %vm411_vm9, %v136_v53, 0.0  ;;  %v169_v2 = vsel %vm103_vm10, %v137_v54, 0.0 }
  0x1f   :  { %v170_v3 = vsel %vm104_vm11, %v138_v55, 0.0  ;;  %vm115_vm6 = vcmp.eq.s32.totalorder %v401_v41, %v370_v15  ;;  %vm116_vm7 = vcmp.eq.s32.totalorder %v403_v42, %v370_v15  ;;  %v143_v4 = vperm.slane %v128_v56, 0 }
  0x20   :  { %v144_v5 = vperm.slane %v128_v56, 1  ;;  %v145_v6 = vperm.slane %v130_v57, 0  ;;  %v146_v7 = vperm.slane %v130_v57, 1  ;;  %v147_v8 = vperm.slane %v132_v58, 0 }
  0x21   :  { %v148_v9 = vperm.slane %v132_v58, 1  ;;  %v171_v10 = vsel %vm105_vm12, %v139_v59, 0.0  ;;  %v172_v11 = vsel %vm106_vm13, %v140_v60, 0.0  ;;  %v149_v12 = vperm.slane %v134_v61, 0 }
  0x22   :  { %v150_v13 = vperm.slane %v134_v61, 1  ;;  %v199_v14 = vadd.f32 %v169_v2, %v167_v0  ;;  %v206_v16 = vadd.f32 %v170_v3, %v168_v1  ;;  %v173_v17 = vsel %vm107_vm14, %v141_v62, 0.0 }
  0x23   :  { %v174_v18 = vsel %vm108_vm15, %v142_v63, 0.0  ;;  %v213_v19 = vmul.f32 %v167_v0, %v167_v0  ;;  %v214_v20 = vmul.f32 %v168_v1, %v168_v1  ;;  %v215_v23 = vmul.f32 %v169_v2, %v169_v2 }
  0x24   :  { %v200_v21 = vadd.f32 %v199_v14, %v171_v10  ;;  %v207_v22 = vadd.f32 %v206_v16, %v172_v11  ;;  %v216_v24 = vmul.f32 %v170_v3, %v170_v3  ;;  %v175_v25 = vsel %vm109_vm0, %v143_v4, 0.0 }
  0x25   :  { %v176_v26 = vsel %vm110_vm1, %v144_v5, 0.0  ;;  %v177_v27 = vsel %vm111_vm2, %v145_v6, 0.0  ;;  %v178_v28 = vsel %vm563_vm3, %v146_v7, 0.0  ;;  %v217_v47 = vmul.f32 %v171_v10, %v171_v10 }
  0x26   :  { %v201_v45 = vadd.f32 %v200_v21, %v173_v17  ;;  %v208_v46 = vadd.f32 %v207_v22, %v174_v18  ;;  %v218_v48 = vmul.f32 %v172_v11, %v172_v11  ;;  %v179_v49 = vsel %vm113_vm4, %v147_v8, 0.0 }
  0x27   :  { %v180_v50 = vsel %vm114_vm5, %v148_v9, 0.0  ;;  %v219_v51 = vmul.f32 %v173_v17, %v173_v17  ;;  %v220_v52 = vmul.f32 %v174_v18, %v174_v18  ;;  %v229_v55 = vadd.f32 %v215_v23, %v213_v19 }
  0x28   :  { %v202_v53 = vadd.f32 %v201_v45, %v175_v25  ;;  %v209_v54 = vadd.f32 %v208_v46, %v176_v26  ;;  %v236_v56 = vadd.f32 %v216_v24, %v214_v20  ;;  %v221_v57 = vmul.f32 %v175_v25, %v175_v25 }
  0x29   :  { %v222_v58 = vmul.f32 %v176_v26, %v176_v26  ;;  %vm53_vm3 = vcmask 23552   ;;  %v230_v61 = vadd.f32 %v229_v55, %v217_v47  ;;  %v341_v63 = vmov 0.0  }
  0x2a   :  { %v203_v59 = vadd.f32 %v202_v53, %v177_v27  ;;  %v210_v60 = vadd.f32 %v209_v54, %v178_v28  ;;  %v237_v62 = vadd.f32 %v236_v56, %v218_v48  ;;  %54 = vst.msk [vmem:[%s562_s2] sm:$0xff] %vm53_vm3, %v341_v63  ;;  %v181_v0 = vsel %vm115_vm6, %v149_v12, 0.0 }
  0x2b   :  { %v182_v1 = vsel %vm116_vm7, %v150_v13, 0.0  ;;  %v223_v2 = vmul.f32 %v177_v27, %v177_v27  ;;  %v224_v3 = vmul.f32 %v178_v28, %v178_v28  ;;  %v231_v6 = vadd.f32 %v230_v61, %v219_v51 }
  0x2c   :  { %v204_v4 = vadd.f32 %v203_v59, %v179_v49  ;;  %v211_v5 = vadd.f32 %v210_v60, %v180_v50  ;;  %v238_v7 = vadd.f32 %v237_v62, %v220_v52  ;;  %v225_v8 = vmul.f32 %v179_v49, %v179_v49 }
  0x2d   :  { %v226_v9 = vmul.f32 %v180_v50, %v180_v50  ;;  %v183_v10 = vsel %vm406_vm8, 1.0, %v341_v63  ;;  %v185_v11 = vsel %vm103_vm10, 1.0, %v341_v63  ;;  %v232_v16 = vadd.f32 %v231_v6, %v221_v57 }
  0x2e   :  { %v205_v12 = vadd.f32 %v204_v4, %v181_v0  ;;  %v212_v14 = vadd.f32 %v211_v5, %v182_v1  ;;  %v239_v17 = vadd.f32 %v238_v7, %v222_v58  ;;  %v227_v13 = vmul.f32 %v181_v0, %v181_v0 }
  0x2f   :  { %v228_v18 = vmul.f32 %v182_v1, %v182_v1  ;;  %v184_v19 = vsel %vm411_vm9, 1.0, %v341_v63  ;;  %v186_v20 = vsel %vm104_vm11, 1.0, %v341_v63  ;;  %v233_v43 = vadd.f32 %v232_v16, %v223_v2 }
  0x30   :  { %v257_v21 = vadd.f32 %v212_v14, %v205_v12  ;;  %v240_v22 = vadd.f32 %v239_v17, %v224_v3  ;;  %v187_v29 = vsel %vm105_vm12, 1.0, %v341_v63  ;;  %v188_v23 = vsel %vm106_vm13, 1.0, %v341_v63 }
  0x31   :  { %v243_v24 = vadd.f32 %v185_v11, %v183_v10  ;;  %v234_v25 = vadd.f32 %v233_v43, %v225_v8  ;;  %v189_v30 = vsel %vm107_vm14, 1.0, %v341_v63  ;;  %v250_v26 = vadd.f32 %v186_v20, %v184_v19  ;;  %v266_v40 = vld [vmem:[%s562_s2] sm:$0xff] }
  0x32   :  { %258 = vadd.xlane.f32.xlu0 %v257_v21  ;;  %v241_v44 = vadd.f32 %v240_v22, %v226_v9  ;;  %v190_v27 = vsel %vm108_vm15, 1.0, %v341_v63  ;;  %v191_v32 = vsel %vm109_vm0, 1.0, %v341_v63  ;;  %v192_v47 = vsel %vm110_vm1, 1.0, %v341_v63 }
  0x33   :  { %v244_v28 = vadd.f32 %v243_v24, %v187_v29  ;;  %v235_v31 = vadd.f32 %v234_v25, %v227_v13  ;;  %v251_v46 = vadd.f32 %v250_v26, %v188_v23  ;;  %v193_v49 = vsel %vm111_vm2, 1.0, %v341_v63 }
  0x34   :  { %v242_v45 = vadd.f32 %v241_v44, %v228_v18  ;;  %vm568_vm8 = vcmp.eq.s32.totalorder %v395_v38, %v370_v15  ;;  %v195_v35 = vsel %vm113_vm4, 1.0, %v341_v63  ;;  %v196_v36 = vsel %vm114_vm5, 1.0, %v341_v63 }
  0x35   :  { %v245_v48 = vadd.f32 %v244_v28, %v189_v30  ;;  %v252_v34 = vadd.f32 %v251_v46, %v190_v27  ;;  %v194_v50 = vsel %vm568_vm8, 1.0, %v341_v63  ;;  %v197_v37 = vsel %vm115_vm6, 1.0, %v341_v63 }
  0x36   :  { %v260_v33 = vadd.f32 %v242_v45, %v235_v31  ;;  %v198_v38 = vsel %vm116_vm7, 1.0, %v341_v63  ;;  %vm268_vm9 = vcmask 7168   ;;  %vm272_vm10 = vcmask 15368  }
  0x37   :  { %v246_v51 = vadd.f32 %v245_v48, %v191_v32  ;;  %v253_v52 = vadd.f32 %v252_v34, %v192_v47  ;;  %vm276_vm11 = vcmask 23568  }
  0x39   :  { %v247_v53 = vadd.f32 %v246_v51, %v193_v49  ;;  %v254_v54 = vadd.f32 %v253_v52, %v194_v50 }
  0x3a   :  { %261 = vadd.xlane.f32.xlu0 %v260_v33 }
  0x3b   :  { %v248_v55 = vadd.f32 %v247_v53, %v195_v35  ;;  %v255_v56 = vadd.f32 %v254_v54, %v196_v36 }
  0x3d   :  { %v249_v39 = vadd.f32 %v248_v55, %v197_v37  ;;  %v256_v57 = vadd.f32 %v255_v56, %v198_v38 }
  0x3f   :  { %v263_v58 = vadd.f32 %v256_v57, %v249_v39 }
  0x41   :  { %264 = vadd.xlane.f32.xlu1 %v263_v58 }
  0xa5   :  { %v259_v59 = vpop.xlane.xlu0 %258 }
  0xa6   :  { %v267_v60 = vadd.f32 %v266_v40, %v259_v59 }
  0xa8   :  { %269 = vst.msk [vmem:[%s562_s2] sm:$0xff] %vm268_vm9, %v267_v60 }
  0xad   :  { %v262_v41 = vpop.xlane.xlu0 %261 }
  0xaf   :  { %v270_v15 = vld [vmem:[%s562_s2] sm:$0xff] }
  0xb0   :  { %v271_v42 = vadd.f32 %v270_v15, %v262_v41 }
  0xb2   :  { %273 = vst.msk [vmem:[%s562_s2] sm:$0xff] %vm272_vm10, %v271_v42 }
  0xb4   :  { %v265_v61 = vpop.xlane.xlu1 %264 }
  0xb9   :  { %v274_v62 = vld [vmem:[%s562_s2] sm:$0xff] }
  0xba   :  { %v275_v63 = vadd.f32 %v274_v62, %v265_v61 }
  0xbc   :  { %277 = vst.msk [vmem:[%s562_s2] sm:$0xff] %vm276_vm11, %v275_v63 }
  0xbd   :  { %282 = vsyncpa [#allocation3], 1 }
  0xbe   :  { %283 = vsyncpa [#allocation5], 1 }

</bundles_post_ra>
